<compile_context>
chip_gen: v5e
topology: v5e:2x2
jax: 0.10.0
libtpu: 0.0.40
codegen_flags: <defaults>
</compile_context>

<pallas_src>
import jax
import jax.numpy as jnp
import numpy as np
from jax.experimental import pallas as pl
from jax.experimental.pallas import tpu as pltpu

KERNEL1 = 5                     # first Conv1d kernel size
KERNEL2 = 3                     # second Conv1d kernel size
PAD = (KERNEL1 - 1) // 2 + 1    # = 3 replication padding on each side
SEQ_LEN = 8                     # implied by nn.Linear(2 * 8, 8)
SLAB_W = 128                    # parameter-slab lane width (one full vreg row)


def _round8(n):
    return ((n + 7) // 8) * 8


# ---------------------------------------------------------------------------
# static geometry shared by the packer, the wrapper and the kernel
# ---------------------------------------------------------------------------
def _dims(C, B, T, rows1):
    Tp = T + 2 * PAD                      # padded per-batch length (= 14)
    Wp = B * Tp                           # working tile width        (= 28)
    W1 = Wp - (KERNEL1 - 1)               # width after conv1         (= 24)
    W2 = W1 - (KERNEL2 - 1)               # width after conv2         (= 22)
    rows2 = _round8(2 * C)                # fused conv2 output rows
    k1dim = KERNEL1 * 2 * C + 1           # conv1 contraction (+1 bias row)
    k2dim = KERNEL2 * rows1 + 1           # conv2 contraction (+1 bias row)
    kcdim = 2 * W2 + 1                    # fused choose contraction (+1 bias)
    rowsc = _round8(kcdim)
    off = {"w1a": 0,
           "w2a": rows1,
           "w1b": rows1 + rows2,
           "w2b": 2 * rows1 + rows2,
           "wch": 2 * (rows1 + rows2)}
    total_rows = 2 * (rows1 + rows2) + rowsc
    assert k1dim <= SLAB_W and k2dim <= SLAB_W, "conv contraction exceeds 128"
    assert kcdim <= SLAB_W, "choose contraction exceeds 128 slab lanes"
    assert 2 * B * T <= SLAB_W, "fused choose output exceeds 128 lanes"
    return dict(Tp=Tp, Wp=Wp, W1=W1, W2=W2, rows1=rows1, rows2=rows2,
                rowsc=rowsc, k1dim=k1dim, k2dim=k2dim, kcdim=kcdim,
                off=off, total_rows=total_rows)


# ---------------------------------------------------------------------------
# one-time host-side parameter packing (all the row/column gymnastics live
# here, so the kernel never has to swap row halves or add biases)
# ---------------------------------------------------------------------------
def pack_params(params, B, T=SEQ_LEN):
    H = int(params["phi"]["w1"].shape[0])
    C = int(params["phi"]["w2"].shape[0])
    rows1 = _round8(2 * H)
    d = _dims(C, B, T, rows1)
    rows2, rowsc, Tp, W2 = d["rows2"], d["rowsc"], d["Tp"], d["W2"]
    slab = np.zeros((d["total_rows"], SLAB_W), np.float32)

    def conv1_block(top, bot):
        # Anti-diagonal packing: the TOP output half reads the BOTTOM input
        # half and vice versa, which keeps every later activation tile in its
        # natural [c; d] / [u_d; p_c] row order with zero in-kernel shuffles.
        blk = np.zeros((rows1, SLAB_W), np.float32)
        wt = np.asarray(top["w1"], np.float32)
        bt = np.asarray(top["b1"], np.float32).reshape(-1)
        wb = np.asarray(bot["w1"], np.float32)
        bb = np.asarray(bot["b1"], np.float32).reshape(-1)
        for kk in range(KERNEL1):
            blk[0:H, kk * 2 * C + C: kk * 2 * C + 2 * C] = wt[:, :, kk]
            blk[H:2 * H, kk * 2 * C: kk * 2 * C + C] = wb[:, :, kk]
        blk[0:H, KERNEL1 * 2 * C] = bt          # bias folded into the matmul
        blk[H:2 * H, KERNEL1 * 2 * C] = bb
        return blk

    def conv2_block(top, bot):
        blk = np.zeros((rows2, SLAB_W), np.float32)
        wt = np.asarray(top["w2"], np.float32)
        bt = np.asarray(top["b2"], np.float32).reshape(-1)
        wb = np.asarray(bot["w2"], np.float32)
        bb = np.asarray(bot["b2"], np.float32).reshape(-1)
        for kk in range(KERNEL2):
            blk[0:C, kk * rows1: kk * rows1 + H] = wt[:, :, kk]
            blk[C:2 * C, kk * rows1 + H: kk * rows1 + 2 * H] = wb[:, :, kk]
        blk[0:C, KERNEL2 * rows1] = bt
        blk[C:2 * C, KERNEL2 * rows1] = bb
        return blk

    def choose_block():
        # One (rowsc, 128) weight that fuses choose_1 and choose_2: contraction
        # lanes = [dc cols (W2) | up cols (W2) | ones | pad], output cols
        # [0, B*T) = y1 (valid for rows 0:C), [B*T, 2*B*T) = y2 (rows C:2C).
        blk = np.zeros((rowsc, SLAB_W), np.float32)
        for col0, name in ((0, "choose_1"), (B * T, "choose_2")):
            w = np.asarray(params[name]["w"], np.float32)        # (T, 2T)
            bv = np.asarray(params[name]["b"], np.float32).reshape(-1)
            for b in range(B):
                for t in range(T):
                    n = col0 + b * T + t
                    blk[b * Tp: b * Tp + T, n] = w[t, :T]
                    blk[W2 + b * Tp: W2 + b * Tp + T, n] = w[t, T:]
                    blk[2 * W2, n] = bv[t]
        return blk

    off = d["off"]
    slab[off["w1a"]: off["w1a"] + rows1] = conv1_block(params["psi"], params["phi"])
    slab[off["w2a"]: off["w2a"] + rows2] = conv2_block(params["psi"], params["phi"])
    slab[off["w1b"]: off["w1b"] + rows1] = conv1_block(params["U"], params["P"])
    slab[off["w2b"]: off["w2b"] + rows2] = conv2_block(params["U"], params["P"])
    slab[off["wch"]: off["wch"] + rowsc] = choose_block()
    return jnp.asarray(slab)


# ---------------------------------------------------------------------------
# Pallas kernel: whole forward on VMEM-resident tiles, 5 MXU matmuls total
# ---------------------------------------------------------------------------
def _build_kernel(B, T, C, dims):
    Tp, Wp, W2 = dims["Tp"], dims["Wp"], dims["W2"]
    rows1, rows2, rowsc = dims["rows1"], dims["rows2"], dims["rowsc"]
    k1dim, k2dim, kcdim = dims["k1dim"], dims["k2dim"], dims["kcdim"]
    off = dims["off"]

    def kernel(x_ref, p_ref, out_ref):
        def wblock(name, nrows):
            # 8-aligned row block, full 128-lane width -> unmasked load.
            return p_ref[pl.ds(off[name], nrows), :]

        def conv(a, name, nrows, k, kdim):
            # im2col as k full-width lane slices; bias folded in via a ones row.
            wout = a.shape[1] - (k - 1)
            taps = [a[:, kk:kk + wout] for kk in range(k)]
            taps.append(jnp.ones((1, wout), jnp.float32))
            patches = jnp.concatenate(taps, axis=0)          # (kdim, wout)
            w = wblock(name, nrows)
            return jnp.dot(w[:, :kdim], patches,
                           preferred_element_type=jnp.float32)

        def stage(a, name1, name2):
            h = conv(a, name1, rows1, KERNEL1, k1dim)        # (rows1, W1)
            h = jnp.maximum(h, 0.01 * h)                     # LeakyReLU(0.01)
            # TODO(synk): nn.Dropout(p=0.5) modelled as eval-mode identity.
            g = conv(h, name2, rows2, KERNEL2, k2dim)        # (rows2, W2)
            return jnp.tanh(g[:2 * C])                       # (2C, W2)

        x = x_ref[...]                                       # (4C, Wp)

        # Stage A (phi + psi fused): rows of g are [psi(x2); phi(x1)], so that
        # multiplying by x rows [x1; x2] gives [c; d] directly (no row swap).
        g = stage(x[:2 * C], "w1a", "w2a")
        dc = x[2 * C:, :W2] * jnp.exp(g)                     # rows: [c; d]

        # ReplicationPad1d((PAD, PAD)) along each batch's time segment.
        pieces = []
        for b in range(B):
            seg = dc[:, b * Tp: b * Tp + T]
            pieces += [jnp.broadcast_to(seg[:, :1], (2 * C, PAD)),
                       seg,
                       jnp.broadcast_to(seg[:, T - 1:T], (2 * C, PAD))]
        dc_pad = jnp.concatenate(pieces, axis=1)             # (2C, Wp)

        # Stage B (U + P fused): rows of up are [u_d; p_c].
        up = stage(dc_pad, "w1b", "w2b")

        # Fused choose_1 / choose_2: one matmul against a pre-packed weight
        # that embeds the per-batch block structure, garbage-column zeroing
        # and both biases.  Result rows 0:C, cols 0:B*T = y1; rows C:2C,
        # cols B*T:2*B*T = y2 (both already in layout L).
        z_parts = [dc, up, jnp.ones((2 * C, 1), jnp.float32)]
        if rowsc > kcdim:
            z_parts.append(jnp.zeros((2 * C, rowsc - kcdim), jnp.float32))
        z = jnp.concatenate(z_parts, axis=1)                 # (2C, rowsc)
        out_ref[...] = jnp.dot(z, wblock("wch", rowsc),
                               preferred_element_type=jnp.float32)

    return kernel


# ---------------------------------------------------------------------------
# wrapper: all layout plumbing (permutes, padding, output slicing) lives here
# ---------------------------------------------------------------------------
@jax.jit
def interactor_forward(x1, x2, packed):
    """x1, x2: (B, T, C) like the PyTorch module. `packed` = pack_params(...)."""
    B, T, C = x1.shape
    assert T == SEQ_LEN, "module hard-codes nn.Linear(2*8, 8) => T must be 8"
    Tp = T + 2 * PAD
    W2 = B * Tp - (KERNEL1 - 1) - (KERNEL2 - 1)
    rows2 = _round8(2 * C)
    rowsc = _round8(2 * W2 + 1)
    rows1 = (packed.shape[0] - 2 * rows2 - rowsc) // 2
    dims = _dims(C, B, T, rows1)
    assert packed.shape == (dims["total_rows"], SLAB_W)

    f32 = jnp.float32
    x1p = jnp.transpose(x1, (0, 2, 1)).astype(f32)           # (B, C, T)
    x2p = jnp.transpose(x2, (0, 2, 1)).astype(f32)

    def pad_layout(xp):
        # replication-padded layout L: (C, B*Tp)
        left = jnp.broadcast_to(xp[:, :, :1], (B, C, PAD))
        right = jnp.broadcast_to(xp[:, :, T - 1:], (B, C, PAD))
        seg = jnp.concatenate([left, xp, right], axis=2)      # (B, C, Tp)
        return jnp.transpose(seg, (1, 0, 2)).reshape(C, B * Tp)

    def la_layout(xp):
        # left-aligned (unpadded) layout L: valid at cols [b*Tp, b*Tp+T)
        seg = jnp.concatenate(
            [xp, jnp.zeros((B, C, Tp - T), f32)], axis=2)     # (B, C, Tp)
        return jnp.transpose(seg, (1, 0, 2)).reshape(C, B * Tp)

    x_in = jnp.concatenate(
        [pad_layout(x1p), pad_layout(x2p), la_layout(x1p), la_layout(x2p)],
        axis=0)                                               # (4C, B*Tp)

    vmem = pl.BlockSpec(memory_space=pltpu.MemorySpace.VMEM)
    out = pl.pallas_call(
        _build_kernel(B, T, C, dims),
        out_shape=jax.ShapeDtypeStruct((2 * C, SLAB_W), jnp.float32),
        in_specs=[vmem, vmem],
        out_specs=vmem,
    )(x_in, packed)

    y1 = out[:C, :B * T].reshape(C, B, T).transpose(1, 2, 0)          # (B,T,C)
    y2 = out[C:2 * C, B * T:2 * B * T].reshape(C, B, T).transpose(1, 2, 0)
    return y1, y2


# ---------------------------------------------------------------------------
# parameter init + pure-JAX reference (correctness check only)
# ---------------------------------------------------------------------------
def init_params(in_planes, hidden_size=1, key=jax.random.PRNGKey(42)):
    hid = int(in_planes * hidden_size)
    params = {}
    keys = jax.random.split(key, 20)
    i = 0
    for name in ("phi", "psi", "U", "P"):
        params[name] = dict(
            w1=0.1 * jax.random.normal(keys[i + 0], (hid, in_planes, KERNEL1),
                                       jnp.float32),
            b1=0.1 * jax.random.normal(keys[i + 1], (1, hid), jnp.float32),
            w2=0.1 * jax.random.normal(keys[i + 2], (in_planes, hid, KERNEL2),
                                       jnp.float32),
            b2=0.1 * jax.random.normal(keys[i + 3], (1, in_planes),
                                       jnp.float32),
        )
        i += 4
    for name in ("choose_1", "choose_2"):
        params[name] = dict(
            w=0.1 * jax.random.normal(keys[i + 0], (SEQ_LEN, 2 * SEQ_LEN),
                                      jnp.float32),
            b=0.1 * jax.random.normal(keys[i + 1], (1, SEQ_LEN), jnp.float32),
        )
        i += 2
    return params


_HI = jax.lax.Precision.HIGHEST


def _ref_rep_pad(x, pad_l, pad_r):
    B, C, L = x.shape
    left = jnp.broadcast_to(x[:, :, :1], (B, C, pad_l))
    right = jnp.broadcast_to(x[:, :, L - 1:], (B, C, pad_r))
    return jnp.concatenate([left, x, right], axis=2)


def _ref_conv1d(x, w, b):
    B, K = x.shape[0], w.shape[2]
    L_out = x.shape[2] - K + 1
    outs = []
    for bi in range(B):
        acc = jnp.zeros((w.shape[0], L_out), jnp.float32)
        for k in range(K):
            acc = acc + jnp.dot(w[:, :, k], x[bi, :, k:k + L_out], precision=_HI)
        outs.append(acc)
    return jnp.stack(outs, axis=0) + b[0][None, :, None]


def _ref_branch(x, w1, b1, w2, b2):
    h = _ref_conv1d(_ref_rep_pad(x, PAD, PAD), w1, b1)
    h = jnp.where(h > 0, h, 0.01 * h)
    h = _ref_conv1d(h, w2, b2)
    return jnp.tanh(h)


def _ref_linear_over_time(x, w, b):
    outs = [jnp.dot(x[bi], w.T, precision=_HI) for bi in range(x.shape[0])]
    return jnp.stack(outs, axis=0) + b[0][None, None, :]


def reference_forward(x1, x2, params):
    x1p = jnp.transpose(x1, (0, 2, 1)).astype(jnp.float32)
    x2p = jnp.transpose(x2, (0, 2, 1)).astype(jnp.float32)
    phi, psi, U, P = params["phi"], params["psi"], params["U"], params["P"]
    d = x2p * jnp.exp(_ref_branch(x1p, phi["w1"], phi["b1"], phi["w2"], phi["b2"]))
    c = x1p * jnp.exp(_ref_branch(x2p, psi["w1"], psi["b1"], psi["w2"], psi["b2"]))
    u_d = _ref_branch(d, U["w1"], U["b1"], U["w2"], U["b2"])
    p_c = _ref_branch(c, P["w1"], P["b1"], P["w2"], P["b2"])
    y1 = _ref_linear_over_time(jnp.concatenate([c, u_d], -1),
                               params["choose_1"]["w"], params["choose_1"]["b"])
    y2 = _ref_linear_over_time(jnp.concatenate([d, p_c], -1),
                               params["choose_2"]["w"], params["choose_2"]["b"])
    return jnp.transpose(y1, (0, 2, 1)), jnp.transpose(y2, (0, 2, 1))


if __name__ == "__main__":
    B, C, T = 2, 4, SEQ_LEN       # batch=2, in_planes=4, seq=8 (from Linear(16, 8))
    key = jax.random.PRNGKey(0)
    k1, k2, kp = jax.random.split(key, 3)
    x1 = jax.random.normal(k1, (B, T, C), jnp.float32)
    x2 = jax.random.normal(k2, (B, T, C), jnp.float32)
    params = init_params(C, hidden_size=1, key=kp)

    packed = pack_params(params, B, T)          # one-time parameter packing

    y1, y2 = interactor_forward(x1, x2, packed)
    jax.block_until_ready((y1, y2))

    r1, r2 = reference_forward(x1, x2, params)
    assert y1.shape == (B, T, C) and y2.shape == (B, T, C)
    assert bool(jnp.all(jnp.isfinite(y1))) and bool(jnp.all(jnp.isfinite(y2)))
    # Small margin: the kernel uses a fused block-diagonal matmul decomposition
    # so f32 summation order differs from the per-tap reference.
    assert jnp.allclose(y1, r1, atol=5e-3, rtol=5e-3)
    assert jnp.allclose(y2, r2, atol=5e-3, rtol=5e-3)
    print("KERNEL_OK")
</pallas_src>

<mosaic_0001>
module attributes {stable_mosaic.version = 11 : i64} {
  func.func @kernel(%arg0: memref<16x28xf32, #tpu.memory_space<vmem>>, %arg1: memref<80x128xf32, #tpu.memory_space<vmem>>, %arg2: memref<8x128xf32, #tpu.memory_space<vmem>>) attributes {dimension_semantics = [], scalar_prefetch = 0 : i64, scratch_operands = 0 : i64, tpu.core_type = #tpu.core_type<tc>} {
    %c0 = arith.constant 0 : index
    %c0_0 = arith.constant 0 : index
    %0 = vector.load %arg0[%c0, %c0_0] : memref<16x28xf32, #tpu.memory_space<vmem>>, vector<16x28xf32>
    %1 = vector.extract_strided_slice %0 {offsets = [0, 0], sizes = [8, 28], strides = [1, 1]} : vector<16x28xf32> to vector<8x28xf32>
    %2 = vector.extract_strided_slice %1 {offsets = [0, 0], sizes = [8, 24], strides = [1, 1]} : vector<8x28xf32> to vector<8x24xf32>
    %3 = vector.extract_strided_slice %1 {offsets = [0, 1], sizes = [8, 24], strides = [1, 1]} : vector<8x28xf32> to vector<8x24xf32>
    %4 = vector.extract_strided_slice %1 {offsets = [0, 2], sizes = [8, 24], strides = [1, 1]} : vector<8x28xf32> to vector<8x24xf32>
    %5 = vector.extract_strided_slice %1 {offsets = [0, 3], sizes = [8, 24], strides = [1, 1]} : vector<8x28xf32> to vector<8x24xf32>
    %6 = vector.extract_strided_slice %1 {offsets = [0, 4], sizes = [8, 24], strides = [1, 1]} : vector<8x28xf32> to vector<8x24xf32>
    %cst = arith.constant 1.000000e+00 : f32
    %7 = vector.broadcast %cst : f32 to vector<1x24xf32>
    %8 = tpu.concatenate %2, %3, %4, %5, %6, %7 in 0 : vector<8x24xf32>, vector<8x24xf32>, vector<8x24xf32>, vector<8x24xf32>, vector<8x24xf32>, vector<1x24xf32> -> vector<41x24xf32>
    %c0_1 = arith.constant 0 : index
    %c0_2 = arith.constant 0 : index
    %9 = vector.load %arg1[%c0_1, %c0_2] : memref<80x128xf32, #tpu.memory_space<vmem>>, vector<8x128xf32>
    %10 = vector.extract_strided_slice %9 {offsets = [0, 0], sizes = [8, 41], strides = [1, 1]} : vector<8x128xf32> to vector<8x41xf32>
    %cst_3 = arith.constant dense<0.000000e+00> : vector<8x24xf32>
    %11 = tpu.matmul %10, %8, %cst_3 {dimension_numbers = #tpu.dot_dimension_numbers<[1], [0], [0], [1], [0, 0, 1, 1], [], []>} : vector<8x41xf32>, vector<41x24xf32>, vector<8x24xf32> -> vector<8x24xf32>
    %cst_4 = arith.constant 0.00999999977 : f32
    %12 = vector.broadcast %cst_4 : f32 to vector<8x24xf32>
    %13 = arith.mulf %12, %11 : vector<8x24xf32>
    %14 = arith.maximumf %11, %13 : vector<8x24xf32>
    %15 = vector.extract_strided_slice %14 {offsets = [0, 0], sizes = [8, 22], strides = [1, 1]} : vector<8x24xf32> to vector<8x22xf32>
    %16 = vector.extract_strided_slice %14 {offsets = [0, 1], sizes = [8, 22], strides = [1, 1]} : vector<8x24xf32> to vector<8x22xf32>
    %17 = vector.extract_strided_slice %14 {offsets = [0, 2], sizes = [8, 22], strides = [1, 1]} : vector<8x24xf32> to vector<8x22xf32>
    %cst_5 = arith.constant 1.000000e+00 : f32
    %18 = vector.broadcast %cst_5 : f32 to vector<1x22xf32>
    %19 = tpu.concatenate %15, %16, %17, %18 in 0 : vector<8x22xf32>, vector<8x22xf32>, vector<8x22xf32>, vector<1x22xf32> -> vector<25x22xf32>
    %c8 = arith.constant 8 : index
    %c0_6 = arith.constant 0 : index
    %20 = vector.load %arg1[%c8, %c0_6] : memref<80x128xf32, #tpu.memory_space<vmem>>, vector<8x128xf32>
    %21 = vector.extract_strided_slice %20 {offsets = [0, 0], sizes = [8, 25], strides = [1, 1]} : vector<8x128xf32> to vector<8x25xf32>
    %cst_7 = arith.constant dense<0.000000e+00> : vector<8x22xf32>
    %22 = tpu.matmul %21, %19, %cst_7 {dimension_numbers = #tpu.dot_dimension_numbers<[1], [0], [0], [1], [0, 0, 1, 1], [], []>} : vector<8x25xf32>, vector<25x22xf32>, vector<8x22xf32> -> vector<8x22xf32>
    %23 = math.tanh %22 : vector<8x22xf32>
    %24 = vector.extract_strided_slice %0 {offsets = [8, 0], sizes = [8, 22], strides = [1, 1]} : vector<16x28xf32> to vector<8x22xf32>
    %25 = math.exp %23 : vector<8x22xf32>
    %26 = arith.mulf %24, %25 : vector<8x22xf32>
    %27 = vector.extract_strided_slice %26 {offsets = [0, 0], sizes = [8, 8], strides = [1, 1]} : vector<8x22xf32> to vector<8x8xf32>
    %28 = vector.extract_strided_slice %27 {offsets = [0, 0], sizes = [8, 1], strides = [1, 1]} : vector<8x8xf32> to vector<8x1xf32>
    %29 = vector.shape_cast %28 : vector<8x1xf32> to vector<8x1xf32>
    %30 = vector.broadcast %29 : vector<8x1xf32> to vector<8x3xf32>
    %31 = vector.extract_strided_slice %27 {offsets = [0, 7], sizes = [8, 1], strides = [1, 1]} : vector<8x8xf32> to vector<8x1xf32>
    %32 = vector.shape_cast %31 : vector<8x1xf32> to vector<8x1xf32>
    %33 = vector.broadcast %32 : vector<8x1xf32> to vector<8x3xf32>
    %34 = vector.extract_strided_slice %26 {offsets = [0, 14], sizes = [8, 8], strides = [1, 1]} : vector<8x22xf32> to vector<8x8xf32>
    %35 = vector.extract_strided_slice %34 {offsets = [0, 0], sizes = [8, 1], strides = [1, 1]} : vector<8x8xf32> to vector<8x1xf32>
    %36 = vector.shape_cast %35 : vector<8x1xf32> to vector<8x1xf32>
    %37 = vector.broadcast %36 : vector<8x1xf32> to vector<8x3xf32>
    %38 = vector.extract_strided_slice %34 {offsets = [0, 7], sizes = [8, 1], strides = [1, 1]} : vector<8x8xf32> to vector<8x1xf32>
    %39 = vector.shape_cast %38 : vector<8x1xf32> to vector<8x1xf32>
    %40 = vector.broadcast %39 : vector<8x1xf32> to vector<8x3xf32>
    %41 = tpu.concatenate %30, %27, %33, %37, %34, %40 in 1 : vector<8x3xf32>, vector<8x8xf32>, vector<8x3xf32>, vector<8x3xf32>, vector<8x8xf32>, vector<8x3xf32> -> vector<8x28xf32>
    %42 = vector.extract_strided_slice %41 {offsets = [0, 0], sizes = [8, 24], strides = [1, 1]} : vector<8x28xf32> to vector<8x24xf32>
    %43 = vector.extract_strided_slice %41 {offsets = [0, 1], sizes = [8, 24], strides = [1, 1]} : vector<8x28xf32> to vector<8x24xf32>
    %44 = vector.extract_strided_slice %41 {offsets = [0, 2], sizes = [8, 24], strides = [1, 1]} : vector<8x28xf32> to vector<8x24xf32>
    %45 = vector.extract_strided_slice %41 {offsets = [0, 3], sizes = [8, 24], strides = [1, 1]} : vector<8x28xf32> to vector<8x24xf32>
    %46 = vector.extract_strided_slice %41 {offsets = [0, 4], sizes = [8, 24], strides = [1, 1]} : vector<8x28xf32> to vector<8x24xf32>
    %cst_8 = arith.constant 1.000000e+00 : f32
    %47 = vector.broadcast %cst_8 : f32 to vector<1x24xf32>
    %48 = tpu.concatenate %42, %43, %44, %45, %46, %47 in 0 : vector<8x24xf32>, vector<8x24xf32>, vector<8x24xf32>, vector<8x24xf32>, vector<8x24xf32>, vector<1x24xf32> -> vector<41x24xf32>
    %c16 = arith.constant 16 : index
    %c0_9 = arith.constant 0 : index
    %49 = vector.load %arg1[%c16, %c0_9] : memref<80x128xf32, #tpu.memory_space<vmem>>, vector<8x128xf32>
    %50 = vector.extract_strided_slice %49 {offsets = [0, 0], sizes = [8, 41], strides = [1, 1]} : vector<8x128xf32> to vector<8x41xf32>
    %cst_10 = arith.constant dense<0.000000e+00> : vector<8x24xf32>
    %51 = tpu.matmul %50, %48, %cst_10 {dimension_numbers = #tpu.dot_dimension_numbers<[1], [0], [0], [1], [0, 0, 1, 1], [], []>} : vector<8x41xf32>, vector<41x24xf32>, vector<8x24xf32> -> vector<8x24xf32>
    %cst_11 = arith.constant 0.00999999977 : f32
    %52 = vector.broadcast %cst_11 : f32 to vector<8x24xf32>
    %53 = arith.mulf %52, %51 : vector<8x24xf32>
    %54 = arith.maximumf %51, %53 : vector<8x24xf32>
    %55 = vector.extract_strided_slice %54 {offsets = [0, 0], sizes = [8, 22], strides = [1, 1]} : vector<8x24xf32> to vector<8x22xf32>
    %56 = vector.extract_strided_slice %54 {offsets = [0, 1], sizes = [8, 22], strides = [1, 1]} : vector<8x24xf32> to vector<8x22xf32>
    %57 = vector.extract_strided_slice %54 {offsets = [0, 2], sizes = [8, 22], strides = [1, 1]} : vector<8x24xf32> to vector<8x22xf32>
    %cst_12 = arith.constant 1.000000e+00 : f32
    %58 = vector.broadcast %cst_12 : f32 to vector<1x22xf32>
    %59 = tpu.concatenate %55, %56, %57, %58 in 0 : vector<8x22xf32>, vector<8x22xf32>, vector<8x22xf32>, vector<1x22xf32> -> vector<25x22xf32>
    %c24 = arith.constant 24 : index
    %c0_13 = arith.constant 0 : index
    %60 = vector.load %arg1[%c24, %c0_13] : memref<80x128xf32, #tpu.memory_space<vmem>>, vector<8x128xf32>
    %61 = vector.extract_strided_slice %60 {offsets = [0, 0], sizes = [8, 25], strides = [1, 1]} : vector<8x128xf32> to vector<8x25xf32>
    %cst_14 = arith.constant dense<0.000000e+00> : vector<8x22xf32>
    %62 = tpu.matmul %61, %59, %cst_14 {dimension_numbers = #tpu.dot_dimension_numbers<[1], [0], [0], [1], [0, 0, 1, 1], [], []>} : vector<8x25xf32>, vector<25x22xf32>, vector<8x22xf32> -> vector<8x22xf32>
    %63 = math.tanh %62 : vector<8x22xf32>
    %cst_15 = arith.constant 1.000000e+00 : f32
    %64 = vector.broadcast %cst_15 : f32 to vector<8x1xf32>
    %cst_16 = arith.constant 0.000000e+00 : f32
    %65 = vector.broadcast %cst_16 : f32 to vector<8x3xf32>
    %66 = tpu.concatenate %26, %63, %64, %65 in 1 : vector<8x22xf32>, vector<8x22xf32>, vector<8x1xf32>, vector<8x3xf32> -> vector<8x48xf32>
    %c32 = arith.constant 32 : index
    %c0_17 = arith.constant 0 : index
    %67 = vector.load %arg1[%c32, %c0_17] : memref<80x128xf32, #tpu.memory_space<vmem>>, vector<48x128xf32>
    %cst_18 = arith.constant dense<0.000000e+00> : vector<8x128xf32>
    %68 = tpu.matmul %66, %67, %cst_18 {dimension_numbers = #tpu.dot_dimension_numbers<[1], [0], [0], [1], [0, 0, 1, 1], [], []>} : vector<8x48xf32>, vector<48x128xf32>, vector<8x128xf32> -> vector<8x128xf32>
    %c0_19 = arith.constant 0 : index
    %c0_20 = arith.constant 0 : index
    %69 = vector.load %arg2[%c0_19, %c0_20] : memref<8x128xf32, #tpu.memory_space<vmem>>, vector<8x128xf32>
    tpu.vector_store %arg2[%c0_19, %c0_20], %68 {strides = array<i32>} : memref<8x128xf32, #tpu.memory_space<vmem>>, vector<8x128xf32>,
    return
  }
}

</mosaic_0001>

<bundles_post_ra>
// kernel: interactor_forward.1
= control target key start
LH: loop header
LB: loop body
LE: loop exit
PB: predicated region body
PF: predicated region fallthrough
CT: control target
= control target key end

     0   :  { %vm31_vm0 = vcmask 1040384   ;;  %v269_v1 = vmov 1.0   ;;  %s270_s11 = smov 124   ;;  %s271_s12 = smov 126   ;;  %vm27_vm1 = vcmask 334848   ;;  %vm65_vm2 = vcmask 203776   ;;  %s363_s0 = inlined_call_operand.vmem [shape: f32[16,28], index: 0, kind: input, shape index: {}]   ;;  %s364_s1 = inlined_call_operand.vmem [shape: f32[80,128], index: 1, kind: input, shape index: {}]   ;;  %s365_s2 = inlined_call_operand.vmem [shape: f32[8,128], index: 2, kind: output, shape index: {}]  }
   0x1   :  { %v11_v0 = vld [vmem:[%s363_s0] sm:$0xff]  ;;  %238 = vmatpush.msk.msra.mxu0 %vm31_vm0, %v269_v1  ;;  %240 = vmatpush.msk.msra.mxu3 %vm31_vm0, %v269_v1  ;;  %s272_s13 = smov 125   ;;  %s273_s14 = smov 127   ;;  %v64_v12 = vld [vmem:[%s364_s1 + $0x8] sm:$0xff]  ;;  %v274_v13 = vmov 7   ;;  %v275_v14 = vmov 0  }
   0x2   :  { %23 = vrot.lane.b32.xlu0 %v11_v0, %s270_s11  ;;  %17 = vrot.lane.b32.xlu1 %v11_v0, %s271_s12  ;;  %v26_v6 = vld [vmem:[%s364_s1] sm:$0xff]  ;;  %v276_v15 = vmov 14   ;;  %v12_v19 = vld [vmem:[%s363_s0 + $0x8] sm:$0xff]  ;;  %s277_s21 = smov 3   ;;  %v278_v22 = vmov 21   ;;  %vm113_vm3 = vcmask 23552  }
   0x3   :  { %242 = vmatpush.msk.msra.mxu2 %vm31_vm0, %v269_v1  ;;  %259 = vset.pattern.permute.xlu2 %v274_v13  ;;  %vm115_vm4 = vcmask 89088   ;;  %vm117_vm5 = vcmask 113664   ;;  %vm119_vm6 = vcmask 138240   ;;  %v135_v37 = vld [vmem:[%s364_s1 + $0x10] sm:$0xff]  ;;  %v168_v43 = vld [vmem:[%s364_s1 + $0x18] sm:$0xff]  ;;  %v208_v44 = vld [vmem:[%s364_s1 + $0x48] sm:$0xff] }
   0x4   :  { %258 = vset.pattern.permute.xlu0 %v275_v14  ;;  %260 = vset.pattern.permute.xlu1 %v276_v15  ;;  %v207_v45 = vld [vmem:[%s364_s1 + $0x40] sm:$0xff]  ;;  %v206_v46 = vld [vmem:[%s364_s1 + $0x38] sm:$0xff]  ;;  %v205_v47 = vld [vmem:[%s364_s1 + $0x30] sm:$0xff]  ;;  %s279_s5 = smov 22   ;;  %vm197_vm7 = vcmask 179200   ;;  %vm199_vm8 = vcmask 359424  }
   0x5   :  { %223 = vmatpush.msra.mxu1 %v208_v44  ;;  %v204_v50 = vld [vmem:[%s364_s1 + $0x28] sm:$0xff]  ;;  %v203_v51 = vld [vmem:[%s364_s1 + $0x20] sm:$0xff]  ;;  %vm201_vm9 = vcmask 367616   ;;  %vm209_vm10 = vcmask 392192  }
   0x7   :  { %224 = vmatpush.msra.mxu1 %v207_v45 }
   0x9   :  { %225 = vmatpush.msra.mxu1 %v206_v46 }
   0xa   :  { %20 = vrot.lane.b32.xlu0 %v11_v0, %s272_s13  ;;  %14 = vrot.lane.b32.xlu1 %v11_v0, %s273_s14 }
   0xb   :  { %226 = vmatpush.msra.mxu1 %v205_v47 }
   0xd   :  { %227 = vmatpush.msra.mxu1 %v204_v50 }
   0xf   :  { %228 = vmatpush.msra.mxu1 %v203_v51 }
  0x74   :  { %v24_v2 = vpop.permute.xlu0 %23  ;;  %v18_v3 = vpop.permute.xlu1 %17 }
  0x75   :  { %46 = vmatpush.msra.mxu0 %v24_v2 }
  0x7c   :  { %v21_v4 = vpop.permute.xlu0 %20  ;;  %v15_v5 = vpop.permute.xlu1 %14 }
  0x7d   :  { %47 = vmatpush.msra.mxu0 %v21_v4 }
  0x7f   :  { %48 = vmatpush.msra.mxu0 %v18_v3 }
  0x81   :  { %49 = vmatpush.msra.mxu0 %v15_v5 }
  0x83   :  { %50 = vmatpush.msra.mxu0 %v11_v0 }
  0x84   :  { %239 = vmatmul.msk.f32.vlgmr.msra.gmra.mxu0 %vm27_vm1, %v26_v6 }
 0x101   :  { %v52_v7 = vpop.f32.mrf.mxu0 }
 0x102   :  { %v55_v8 = vmul.f32 0.01, %v52_v7 }
 0x104   :  { %v56_v9 = vmax.f32 %v52_v7, %v55_v8 }
 0x106   :  { %61 = vrot.lane.b32.xlu2 %v56_v9, %s271_s12 }
 0x10e   :  { %58 = vrot.lane.b32.xlu2 %v56_v9, %s273_s14 }
 0x160   :  { %v62_v10 = vpop.permute.xlu2 %61 }
 0x161   :  { %82 = vmatpush.msra.mxu3 %v62_v10 }
 0x168   :  { %v59_v11 = vpop.permute.xlu2 %58 }
 0x169   :  { %83 = vmatpush.msra.mxu3 %v59_v11 }
 0x16b   :  { %84 = vmatpush.msra.mxu3 %v56_v9 }
 0x16c   :  { %241 = vmatmul.msk.f32.vlgmr.msra.gmra.mxu3 %vm65_vm2, %v64_v12 }
 0x16d   :  { %244 = vmatpush.msk.msrb.mxu3 %vm31_vm0, %v269_v1 }
 0x1ef   :  { %v86_v16 = vpop.f32.mrf.mxu3 }
 0x1f0   :  { %263 = vtanh.f32 %v86_v16 }
 0x1f6   :  { %v264_v17 = vpop.eup %263 }
 0x1f7   :  { %v90_v18 = vmul.f32 1.442695, %v264_v17 }
 0x1f9   :  { %265 = vpow2.f32 %v90_v18 }
 0x1ff   :  { %v266_v20 = vpop.eup %265 }
 0x200   :  { %v319_v21 = vmul.f32 %v266_v20, %v12_v19 }
 0x202   :  { %99 = vperm.xlu2 %259, %v319_v21   ;;  %110 = vrot.lane.b32.xlu1 %v319_v21, %s277_s21 }
 0x203   :  { %95 = vperm.xlu0 %258, %v319_v21  }
 0x20a   :  { %261 = vset.pattern.permute.xlu2 %v278_v22  ;;  %103 = vperm.xlu1 %260, %v319_v21  }
 0x20b   :  { %107 = vperm.xlu2 %261, %v319_v21   ;;  %262 = vset.pattern.permute.xlu0 %v278_v22 }
 0x25c   :  { %v100_v23 = vpop.permute.xlu2 %99 }
 0x265   :  { %v108_v30 = vpop.permute.xlu2 %107 }
 0x274   :  { %v111_v24 = vpop.permute.xlu1 %110 }
 0x275   :  { %v96_v25 = vpop.permute.xlu0 %95 }
 0x276   :  { %v114_v26 = vsel %vm113_vm3, %v96_v25, %v111_v24 }
 0x277   :  { %v116_v28 = vsel %vm115_vm4, %v114_v26, %v100_v23 }
 0x27c   :  { %v104_v27 = vpop.permute.xlu1 %103 }
 0x27d   :  { %v118_v29 = vsel %vm117_vm5, %v116_v28, %v104_v27 }
 0x27e   :  { %v120_v31 = vsel %vm119_vm6, %v118_v29, %v111_v24 }
 0x27f   :  { %v121_v32 = vsel %vm65_vm2, %v120_v31, %v108_v30 }
 0x280   :  { %126 = vrot.lane.b32.xlu2 %v121_v32, %s271_s12  ;;  %129 = vrot.lane.b32.xlu1 %v121_v32, %s272_s13 }
 0x281   :  { %132 = vrot.lane.b32.xlu0 %v121_v32, %s270_s11 }
 0x289   :  { %123 = vrot.lane.b32.xlu0 %v121_v32, %s273_s14 }
 0x2da   :  { %v127_v35 = vpop.permute.xlu2 %126 }
 0x2f2   :  { %v130_v34 = vpop.permute.xlu1 %129 }
 0x2f3   :  { %v133_v33 = vpop.permute.xlu0 %132 }
 0x2f4   :  { %150 = vmatpush.msra.mxu2 %v133_v33 }
 0x2f6   :  { %151 = vmatpush.msra.mxu2 %v130_v34 }
 0x2f8   :  { %152 = vmatpush.msra.mxu2 %v127_v35 }
 0x2fb   :  { %v124_v36 = vpop.permute.xlu0 %123 }
 0x2fc   :  { %153 = vmatpush.msra.mxu2 %v124_v36 }
 0x2fe   :  { %154 = vmatpush.msra.mxu2 %v121_v32 }
 0x2ff   :  { %243 = vmatmul.msk.f32.vlgmr.msra.gmra.mxu2 %vm27_vm1, %v135_v37 }
 0x382   :  { %v156_v38 = vpop.f32.mrf.mxu2 }
 0x383   :  { %v159_v39 = vmul.f32 0.01, %v156_v38 }
 0x385   :  { %v160_v40 = vmax.f32 %v156_v38, %v159_v39 }
 0x387   :  { %162 = vrot.lane.b32.xlu2 %v160_v40, %s273_s14  ;;  %165 = vrot.lane.b32.xlu1 %v160_v40, %s271_s12 }
 0x3e1   :  { %v163_v42 = vpop.permute.xlu2 %162 }
 0x3f9   :  { %v166_v41 = vpop.permute.xlu1 %165 }
 0x3fa   :  { %185 = vmatpush.msrb.mxu3 %v166_v41 }
 0x3fc   :  { %186 = vmatpush.msrb.mxu3 %v163_v42 }
 0x3fe   :  { %187 = vmatpush.msrb.mxu3 %v160_v40 }
 0x3ff   :  { %245 = vmatmul.msk.f32.vlgmr.msrb.gmra.mxu3 %vm65_vm2, %v168_v43 }
 0x482   :  { %v189_v48 = vpop.f32.mrf.mxu3 }
 0x483   :  { %267 = vtanh.f32 %v189_v48 }
 0x489   :  { %v268_v49 = vpop.eup %267 }
 0x48a   :  { %194 = vrot.lane.b32.xlu0 %v268_v49, %s279_s5 }
 0x4fc   :  { %v195_v52 = vpop.permute.xlu0 %194 }
 0x4fd   :  { %v198_v53 = vsel %vm197_vm7, %v319_v21, %v195_v52 }
 0x4fe   :  { %v200_v54 = vsel %vm199_vm8, %v198_v53, 1.0 }
 0x4ff   :  { %v202_v55 = vsel %vm201_vm9, %v200_v54, 0.0 }
 0x500   :  { %246 = vmatmul.msk.f32.vlgmr.msra.gmra.mxu1 %vm209_vm10, %v202_v55 }
 0x57d   :  { %v230_v56 = vpop.f32.mrf.mxu1 }
 0x57e   :  { %233 = vst [vmem:[%s365_s2] sm:$0xff] %v230_v56 }

</bundles_post_ra>
